<compile_context>
chip_gen: v7x
topology: tpu7x:2x2x1
jax: 0.10.0
libtpu: 0.0.40
codegen_flags: <defaults>
</compile_context>

<pallas_src>
import functools

import jax
import jax.numpy as jnp
from jax import lax
from jax.experimental import pallas as pl
from jax.experimental.pallas import tpu as pltpu

LANE = 128                            # lane width
SUB = 8                               # sublane granularity (f32)
ALIGN = SUB * LANE                    # kernel prefix alignment (1024 elements)
STEP_BYTES = 8 * 1024 * 1024          # target input bytes per grid step (both streams)
VMEM_LIMIT_BYTES = 32 * 1024 * 1024   # explicit scoped-VMEM budget (>= v5e 16 MiB default,
                                      # <= v7x 64 MiB physical); 16 MiB of stream buffers + slack


def _bce_partial_kernel(x_ref, y_ref, o_ref, *, rows, tile_rows):
    """One (tile_rows, 128) tile of the stable BCE-with-logits partial sum.

    per_i = max(x, 0) - x*y + log1p(exp(-|x|))     (PyTorch's stable formula)

    Rows are folded into an (8, 128) lane-dense partial (pure VALU adds); the
    single cross-lane reduction + 1/n scale happen outside the kernel.  Only
    the last grid step masks its (possibly ragged) rows.
    """
    i = pl.program_id(0)
    last = pl.num_programs(0) - 1

    # DMA native dtype (e.g. bf16 logits / bf16 or int8 labels), widen on the VPU.
    x = x_ref[...].astype(jnp.float32)          # (tile_rows, 128)
    y = y_ref[...].astype(jnp.float32)
    per = jnp.maximum(x, 0.0) - x * y + jnp.log1p(jnp.exp(-jnp.abs(x)))
    n_sub = tile_rows // SUB

    @pl.when(i < last)
    def _():
        # Interior tiles are always fully valid: unmasked row-sum.
        o_ref[...] = per.reshape(n_sub, SUB, LANE).sum(axis=0)

    @pl.when(i == last)
    def _():
        # Row-level mask only (max value ~ n/128, so no int32 overflow for any
        # realistic n).  Lane dim is always full because the wrapper only feeds
        # the 1024-aligned prefix to the kernel.
        row = lax.broadcasted_iota(jnp.int32, (tile_rows, LANE), 0)
        valid = (i * tile_rows + row) < rows
        masked = jnp.where(valid, per, 0.0)     # select neutralizes garbage/NaN
        o_ref[...] = masked.reshape(n_sub, SUB, LANE).sum(axis=0)


def bce_with_logits_mean(logits, labels):
    """Pallas equivalent of nn.BCEWithLogitsLoss()(logits.view(-1), labels).

    Labels may be any numeric dtype (f32/bf16/int8 with values in {0,1});
    they are DMA'd narrow and widened in-kernel, so narrow labels halve the
    second HBM stream.
    """
    x = logits.reshape(-1)
    y = labels.reshape(-1)
    n = x.shape[0]
    assert y.shape[0] == n, "labels must match outputs.view(-1)"

    # 1024-aligned prefix goes through the Pallas kernel; the <=1023-element
    # tail (uncommon for per-pixel heads) is a trivial host-side expression.
    rows_main = (n // ALIGN) * SUB          # multiple of 8 rows
    n_main = rows_main * LANE

    total = jnp.float32(0.0)

    if rows_main > 0:
        # Prefix slice is a no-op when n % 1024 == 0 (the common case).
        # TODO(synk): in the ragged case XLA may materialize the prefix slice
        # once; still strictly cheaper than padding the full array.
        x2 = x[:n_main].reshape(rows_main, LANE)
        y2 = y[:n_main].reshape(rows_main, LANE)

        # Budget-based tile: ~8 MiB of input per step (both streams), i.e.
        # 8192 rows for f32+f32, 16384 for bf16+bf16.  Multiple of 16 keeps
        # bf16 (16,128) sublane packing aligned; min with rows_main keeps the
        # (8,128) block constraint (rows_main is a multiple of 8).
        bytes_per_row = LANE * (x2.dtype.itemsize + y2.dtype.itemsize)
        max_tile_rows = max(16, (STEP_BYTES // bytes_per_row) // 16 * 16)
        tile_rows = min(rows_main, max_tile_rows)
        num_tiles = pl.cdiv(rows_main, tile_rows)

        kernel = functools.partial(
            _bce_partial_kernel, rows=rows_main, tile_rows=tile_rows)

        in_bytes = x2.size * x2.dtype.itemsize + y2.size * y2.dtype.itemsize
        out_bytes = num_tiles * SUB * LANE * 4
        cost = pl.CostEstimate(flops=6 * n_main, transcendentals=2 * n_main,
                               bytes_accessed=in_bytes + out_bytes)

        # TODO(synk): on v7x, verify the tile axis shards across both
        # TensorCores with "parallel"; if not, switch to pltpu.CORE_PARALLEL.
        partials = pl.pallas_call(
            kernel,
            out_shape=jax.ShapeDtypeStruct((num_tiles * SUB, LANE), jnp.float32),
            grid=(num_tiles,),
            in_specs=[
                pl.BlockSpec((tile_rows, LANE), lambda i: (i, 0)),
                pl.BlockSpec((tile_rows, LANE), lambda i: (i, 0)),
            ],
            out_specs=pl.BlockSpec((SUB, LANE), lambda i: (i, 0)),
            compiler_params=pltpu.CompilerParams(
                dimension_semantics=("parallel",),
                vmem_limit_bytes=VMEM_LIMIT_BYTES),
            cost_estimate=cost,
        )(x2, y2)

        total = total + jnp.sum(partials)

    if n_main < n:
        xt = x[n_main:].astype(jnp.float32)
        yt = y[n_main:].astype(jnp.float32)
        total = total + jnp.sum(
            jnp.maximum(xt, 0.0) - xt * yt + jnp.log1p(jnp.exp(-jnp.abs(xt))))

    # n == 0 -> 0/0 = NaN, matching PyTorch's mean reduction over an empty batch.
    return total / jnp.float32(n)


def base_loss_forward(outputs, batch):
    """Mirror of baseLoss.forward: returns (loss, {'loss': loss})."""
    loss = bce_with_logits_mean(outputs, batch["labels"])
    return loss, {"loss": loss}


if __name__ == "__main__":
    key = jax.random.PRNGKey(0)
    k_out, k_lab = jax.random.split(key)

    # outputs: NCHW logits, e.g. a per-pixel classification head.
    outputs = jax.random.normal(k_out, (2, 4, 16, 16), dtype=jnp.float32)
    # labels: flat targets in {0, 1}, same numel as outputs.view(-1).
    labels = jax.random.bernoulli(
        k_lab, p=0.5, shape=(outputs.size,)).astype(jnp.float32)
    batch = {"labels": labels}

    loss, loss_stats = base_loss_forward(outputs, batch)
    loss = jax.block_until_ready(loss)

    # Pure-JAX reference (not part of the hot path).
    xf = outputs.reshape(-1)
    ref = jnp.mean(
        jnp.maximum(xf, 0.0) - xf * labels + jnp.log1p(jnp.exp(-jnp.abs(xf))))
    assert jnp.allclose(loss, ref, rtol=1e-5, atol=1e-5), (loss, ref)
    assert jnp.allclose(loss_stats["loss"], loss)

    print("KERNEL_OK")
</pallas_src>

<mosaic_0001>
module attributes {stable_mosaic.version = 11 : i64} {
  func.func @_bce_partial_kernel(%arg0: i32, %arg1: memref<16x128xf32, #tpu.memory_space<vmem>>, %arg2: memref<16x128xf32, #tpu.memory_space<vmem>>, %arg3: memref<8x128xf32, #tpu.memory_space<vmem>>) attributes {dimension_semantics = [#tpu.dimension_semantics<parallel>], iteration_bounds = array<i64: 1>, scalar_prefetch = 0 : i64, scratch_operands = 0 : i64, tpu.core_type = #tpu.core_type<tc>, window_params = [{transform_indices = @transform_0, window_bounds = array<i64: 16, 128>}, {transform_indices = @transform_1, window_bounds = array<i64: 16, 128>}, {transform_indices = @transform_2, window_bounds = array<i64: 8, 128>}]} {
    %c0 = arith.constant 0 : index
    %c0_0 = arith.constant 0 : index
    %0 = vector.load %arg1[%c0, %c0_0] : memref<16x128xf32, #tpu.memory_space<vmem>>, vector<16x128xf32>
    %c0_1 = arith.constant 0 : index
    %c0_2 = arith.constant 0 : index
    %1 = vector.load %arg2[%c0_1, %c0_2] : memref<16x128xf32, #tpu.memory_space<vmem>>, vector<16x128xf32>
    %cst = arith.constant 0.000000e+00 : f32
    %2 = vector.broadcast %cst : f32 to vector<16x128xf32>
    %3 = arith.maximumf %0, %2 : vector<16x128xf32>
    %4 = arith.mulf %0, %1 : vector<16x128xf32>
    %5 = arith.subf %3, %4 : vector<16x128xf32>
    %6 = math.absf %0 : vector<16x128xf32>
    %cst_3 = arith.constant 0.000000e+00 : f32
    %7 = vector.broadcast %cst_3 : f32 to vector<16x128xf32>
    %8 = arith.subf %7, %6 : vector<16x128xf32>
    %9 = math.exp %8 : vector<16x128xf32>
    %10 = math.log1p %9 : vector<16x128xf32>
    %11 = arith.addf %5, %10 : vector<16x128xf32>
    %c0_i32 = arith.constant 0 : i32
    %12 = arith.cmpi slt, %arg0, %c0_i32 : i32
    %13 = arith.extui %12 : i1 to i32
    %c0_i32_4 = arith.constant 0 : i32
    %14 = arith.cmpi ne, %13, %c0_i32_4 : i32
    scf.if %14 {
      %18 = vector.shape_cast %11 : vector<16x128xf32> to vector<2x8x128xf32>
      %cst_7 = arith.constant dense<0.000000e+00> : vector<8x128xf32>
      %19 = vector.multi_reduction <add>, %18, %cst_7 [0] : vector<2x8x128xf32> to vector<8x128xf32>
      %c0_8 = arith.constant 0 : index
      %c0_9 = arith.constant 0 : index
      %20 = vector.load %arg3[%c0_8, %c0_9] : memref<8x128xf32, #tpu.memory_space<vmem>>, vector<8x128xf32>
      tpu.vector_store %arg3[%c0_8, %c0_9], %19 {strides = array<i32>} : memref<8x128xf32, #tpu.memory_space<vmem>>, vector<8x128xf32>,
    } else {
    }
    %c0_i32_5 = arith.constant 0 : i32
    %15 = arith.cmpi eq, %arg0, %c0_i32_5 : i32
    %16 = arith.extui %15 : i1 to i32
    %c0_i32_6 = arith.constant 0 : i32
    %17 = arith.cmpi ne, %16, %c0_i32_6 : i32
    scf.if %17 {
      %18 = tpu.iota {dimensions = array<i32: 0>} : vector<16x128xi32>
      %c16_i32 = arith.constant 16 : i32
      %19 = arith.muli %arg0, %c16_i32 : i32
      %20 = vector.broadcast %19 : i32 to vector<16x128xi32>
      %21 = arith.addi %20, %18 : vector<16x128xi32>
      %c16_i32_7 = arith.constant 16 : i32
      %22 = vector.broadcast %c16_i32_7 : i32 to vector<16x128xi32>
      %23 = arith.cmpi slt, %21, %22 : vector<16x128xi32>
      %cst_8 = arith.constant 0.000000e+00 : f32
      %24 = vector.broadcast %cst_8 : f32 to vector<16x128xf32>
      %25 = arith.select %23, %11, %24 : vector<16x128xi1>, vector<16x128xf32>
      %26 = vector.shape_cast %25 : vector<16x128xf32> to vector<2x8x128xf32>
      %cst_9 = arith.constant dense<0.000000e+00> : vector<8x128xf32>
      %27 = vector.multi_reduction <add>, %26, %cst_9 [0] : vector<2x8x128xf32> to vector<8x128xf32>
      %c0_10 = arith.constant 0 : index
      %c0_11 = arith.constant 0 : index
      %28 = vector.load %arg3[%c0_10, %c0_11] : memref<8x128xf32, #tpu.memory_space<vmem>>, vector<8x128xf32>
      tpu.vector_store %arg3[%c0_10, %c0_11], %27 {strides = array<i32>} : memref<8x128xf32, #tpu.memory_space<vmem>>, vector<8x128xf32>,
    } else {
    }
    return
  }
  func.func @transform_0(%arg0: i32) -> (i32, i32) {
    %c0_i32 = arith.constant 0 : i32
    %c0_i32_0 = arith.constant 0 : i32
    return %arg0, %c0_i32 : i32, i32
  }
  func.func @transform_1(%arg0: i32) -> (i32, i32) {
    %c0_i32 = arith.constant 0 : i32
    %c0_i32_0 = arith.constant 0 : i32
    return %arg0, %c0_i32 : i32, i32
  }
  func.func @transform_2(%arg0: i32) -> (i32, i32) {
    %c0_i32 = arith.constant 0 : i32
    %c0_i32_0 = arith.constant 0 : i32
    return %arg0, %c0_i32 : i32, i32
  }
}

</mosaic_0001>

<bundles_post_ra>
// kernel: tpu_custom_call.1
= control target key start
LH: loop header
LB: loop body
LE: loop exit
PB: predicated region body
PF: predicated region fallthrough
CT: control target
= control target key end

     0   :  { %7 = vsyncpa [#allocation3], 0  ;;  %s258_s0 = inlined_call_operand.hbm [shape: f32[16,128], index: 0, kind: input, shape index: {}]   ;;  %s259_s1 = inlined_call_operand.hbm [shape: f32[16,128], index: 1, kind: input, shape index: {}]   ;;  %s260_s2 = inlined_call_operand.hbm [shape: f32[8,128], index: 2, kind: output, shape index: {}]  }
   0x1   :  { %8 = vsyncpa [#allocation6], 0 }
   0x2   :  { %9 = vsyncpa [#allocation4], 0  ;;  %s202_s9 = smov [#allocation2]   ;;  %s130_s13 = scalar_lea.hbm %s258_s0, 256 }
   0x3   :  { %s15_s10 = sshll.u32 %s202_s9, 4  ;;  %p131_p0 = scmp.ne.s32.totalorder %s258_s0, %s130_s13  ;;  %s16_s10 = int_to_ptr.vmem [resolvable:$true] %s15_s10 }
   0x4   :  { %p134_p1 = scmp.lt.u32.totalorder %s130_s13, %s258_s0 }
   0x6   :  { %p136_p2 = pnand %p134_p1, %p131_p0 }
   0x8   :  { %139 = shalt.err (!%p136_p2)
}
   0x9   :  { %s140_s18 = scalar_lea.vmem %s16_s10, 256  ;;  %p145_p4 = scmp.lt.s32.totalorder %s16_s10, %s16_s10 }
   0xa   :  { %p141_p3 = scmp.ne.s32.totalorder %s16_s10, %s140_s18  ;;  %p146_p5 = scmp.lt.s32.totalorder %s140_s18, %s140_s18 }
   0xc   :  { %p147_p6 = por %p146_p5, %p145_p4 }
   0xe   :  { %p148_p7 = pnand %p147_p6, %p141_p3 }
  0x10   :  { %151 = shalt.err (!%p148_p7)
}
  0x11   :  { %s203_s19 = smov 128   ;;  %s204_s20 = smov 8  }
  0x12   :  { %21 = dma.hbm_to_vmem [thread:$0]  %s258_s0, 256, %s16_s10, [#allocation3], %s203_s19, %s203_s19, %s204_s20  }
  0x13   :  { %s205_s23 = smov [#allocation5]   ;;  %s152_s27 = scalar_lea.hbm %s259_s1, 256 }
  0x14   :  { %s27_s24 = sshll.u32 %s205_s23, 4  ;;  %p153_p8 = scmp.ne.s32.totalorder %s259_s1, %s152_s27  ;;  %s28_s24 = int_to_ptr.vmem [resolvable:$true] %s27_s24 }
  0x15   :  { %p156_p9 = scmp.lt.u32.totalorder %s152_s27, %s259_s1 }
  0x17   :  { %p158_p10 = pnand %p156_p9, %p153_p8 }
  0x19   :  { %161 = shalt.err (!%p158_p10)
}
  0x1a   :  { %s162_s4 = scalar_lea.vmem %s28_s24, 256  ;;  %p167_p12 = scmp.lt.s32.totalorder %s28_s24, %s28_s24 }
  0x1b   :  { %p163_p11 = scmp.ne.s32.totalorder %s28_s24, %s162_s4  ;;  %p168_p13 = scmp.lt.s32.totalorder %s162_s4, %s162_s4 }
  0x1d   :  { %p169_p0 = por %p168_p13, %p167_p12 }
  0x1f   :  { %p170_p1 = pnand %p169_p0, %p163_p11 }
  0x21   :  { %173 = shalt.err (!%p170_p1)
}
  0x22   :  { %33 = dma.hbm_to_vmem [thread:$0]  %s259_s1, 256, %s28_s24, [#allocation6], %s203_s19, %s203_s19, %s204_s20  }
  0x23   :  { %196 = dma.done.wait [#allocation3], 256  }
  0x24   :  { %197 = vsyncadd [#allocation3], 4294967040 }
  0x25   :  { %198 = dma.done.wait [#allocation6], 256  }
  0x26   :  { %199 = vsyncadd [#allocation6], 4294967040  ;;  %v40_v0 = vld [vmem:[#allocation2] sm:$0xff]  ;;  %v41_v1 = vld [vmem:[#allocation2 + $0x8] sm:$0xff]  ;;  %s206_s1 = smov [#allocation7]  }
  0x27   :  { %v50_v2 = vand.u32 2147483647, %v40_v0  ;;  %v51_v3 = vand.u32 2147483647, %v41_v1  ;;  %v42_v14 = vld [vmem:[#allocation5] sm:$0xff]  ;;  %v43_v15 = vld [vmem:[#allocation5 + $0x8] sm:$0xff] }
  0x28   :  { %v44_v17 = vmax.f32 %v40_v0, 0.0  ;;  %v46_v18 = vmul.f32 %v42_v14, %v40_v0  ;;  %v45_v21 = vmax.f32 %v41_v1, 0.0  ;;  %v47_v22 = vmul.f32 %v43_v15, %v41_v1  ;;  %s107_s6 = sshll.u32 %s206_s1, 4  ;;  %s108_s6 = int_to_ptr.vmem [resolvable:$true] %s107_s6 }
  0x29   :  { %v52_v4 = vsub.f32 0.0, %v50_v2  ;;  %v53_v5 = vsub.f32 0.0, %v51_v3  ;;  %s174_s7 = scalar_lea.vmem %s108_s6, 128  ;;  %p179_p3 = scmp.lt.s32.totalorder %s108_s6, %s108_s6 }
  0x2a   :  { %v48_v26 = vsub.f32 %v44_v17, %v46_v18  ;;  %v49_v29 = vsub.f32 %v45_v21, %v47_v22  ;;  %p175_p2 = scmp.ne.s32.totalorder %s108_s6, %s174_s7  ;;  %p180_p4 = scmp.lt.s32.totalorder %s174_s7, %s174_s7 }
  0x2b   :  { %v54_v6 = vmul.f32 1.442695, %v52_v4  ;;  %v56_v7 = vmul.f32 1.442695, %v53_v5 }
  0x2c   :  { %p181_p5 = por %p180_p4, %p179_p3 }
  0x2d   :  { %122 = vpow2.f32 %v54_v6 }
  0x2e   :  { %124 = vpow2.f32 %v56_v7  ;;  %p182_p6 = pnand %p181_p5, %p175_p2 }
  0x37   :  { %v123_v8 = vpop.eup %122 }
  0x38   :  { %v125_v9 = vpop.eup %124  ;;  %v58_v10 = vadd.f32 1.0, %v123_v8  ;;  %v61_v12 = vmul.f32 -0.5, %v123_v8  ;;  %v64_v19 = vand.u32 2147483647, %v123_v8 }
  0x39   :  { %v67_v11 = vadd.f32 1.0, %v125_v9  ;;  %v70_v13 = vmul.f32 -0.5, %v125_v9  ;;  %v73_v23 = vand.u32 2147483647, %v125_v9 }
  0x3a   :  { %126 = vlog2.f32 %v58_v10  ;;  %v62_v16 = vadd.f32 1.0, %v61_v12  ;;  %vm65_vm0 = vcmp.lt.f32.partialorder %v64_v19, 0.0004427343 }
  0x3b   :  { %128 = vlog2.f32 %v67_v11  ;;  %v71_v20 = vadd.f32 1.0, %v70_v13  ;;  %vm74_vm1 = vcmp.lt.f32.partialorder %v73_v23, 0.0004427343 }
  0x3c   :  { %v63_v24 = vmul.f32 %v123_v8, %v62_v16 }
  0x3d   :  { %v72_v27 = vmul.f32 %v125_v9, %v71_v20 }
  0x44   :  { %v127_v25 = vpop.eup %126 }
  0x45   :  { %v129_v28 = vpop.eup %128  ;;  %v60_v30 = vmul.f32 0.6931472, %v127_v25 }
  0x46   :  { %v69_v31 = vmul.f32 0.6931472, %v129_v28 }
  0x47   :  { %v66_v32 = vsel %vm65_vm0, %v63_v24, %v60_v30 }
  0x48   :  { %v75_v33 = vsel %vm74_vm1, %v72_v27, %v69_v31  ;;  %v76_v34 = vadd.f32 %v66_v32, %v48_v26 }
  0x49   :  { %v77_v35 = vadd.f32 %v75_v33, %v49_v29 }
  0x4b   :  { %v99_v36 = vadd.f32 %v77_v35, %v76_v34 }
  0x4d   :  { %100 = vst [vmem:[#allocation7] sm:$0xff] %v99_v36 }
  0x4e   :  { %185 = shalt.err (!%p182_p6)
}
  0x4f   :  { %s186_s10 = scalar_lea.hbm %s260_s2, 128 }
  0x50   :  { %p187_p7 = scmp.ne.s32.totalorder %s260_s2, %s186_s10  ;;  %p190_p8 = scmp.lt.u32.totalorder %s186_s10, %s260_s2 }
  0x52   :  { %p192_p9 = pnand %p190_p8, %p187_p7 }
  0x54   :  { %195 = shalt.err (!%p192_p9)
}
  0x55   :  { %110 = dma.vmem_to_hbm [thread:$0]  %s108_s6, 128, %s260_s2, [#allocation4]  }
  0x56   :  { %200 = dma.done.wait [#allocation4], 128  }
  0x57   :  { %201 = vsyncadd [#allocation4], 4294967168 }
  0x58   :  { %114 = vsyncpa [#allocation3], 1 }
  0x59   :  { %115 = vsyncpa [#allocation6], 1 }
  0x5a   :  { %116 = vsyncpa [#allocation4], 1 }

</bundles_post_ra>
